<compile_context>
chip_gen: v6e
topology: v6e:2x2x1
jax: 0.10.0
libtpu: 0.0.40
codegen_flags: <defaults>
</compile_context>

<pallas_src>
import jax
import jax.numpy as jnp
from jax import lax
from jax.experimental import pallas as pl
from jax.experimental.pallas import tpu as pltpu


def _molt_output_kernel(x_ref, w_ref, r_ref, o_ref, acc_ref):
    """One (tm, tn) output tile, accumulated over the K (intermediate) grid axis.

    x_ref:   (tm, tk)  activation tile            [rows, intermediate-chunk]
    w_ref:   (tn, tk)  weight tile (PyTorch [H, I] layout chunk)
    r_ref:   (tm, tn)  residual (input_tensor) tile
    o_ref:   (tm, tn)  output tile
    acc_ref: (tm, tn)  f32 accumulator scratch (persists across the K axis)
    """
    k = pl.program_id(2)

    @pl.when(k == 0)
    def _():
        acc_ref[...] = jnp.zeros_like(acc_ref)

    # Contract on the intermediate dim of BOTH operands: weight stays [H, I]
    # (the nn.Linear layout), so no per-call transpose pass over HBM.
    acc_ref[...] += lax.dot_general(
        x_ref[...],
        w_ref[...],
        dimension_numbers=(((1,), (1,)), ((), ())),
        preferred_element_type=jnp.float32,
    )

    @pl.when(k == pl.num_programs(2) - 1)
    def _():
        # TODO(synk): dropout is identity in eval mode; a training-mode kernel
        # would build a keep-mask here via pltpu.prng_seed / prng_random_bits.
        o_ref[...] = (acc_ref[...] + r_ref[...].astype(jnp.float32)).astype(o_ref.dtype)


def _choose_tiles(M, I, H, act_bytes, w_bytes):
    """Pick (tm, tn, tk) so the double-buffered working set fits VMEM."""
    # K/N tiles: keep the full dim when it is small (the (8,128) rule then only
    # requires "equals the full dim"), otherwise MXU-friendly aligned chunks.
    tk = I if (I <= 2048 or I % 512 != 0) else 512
    tn = H if (H <= 1024 or H % 256 != 0) else 256

    # Minimum row tile honoring sublane packing for narrow dtypes
    # (f32 -> 8, bf16 -> 16, 8-bit -> 32).
    min_tm = max(8, (32 // max(1, act_bytes)) * 8 // 4 * 4)
    min_tm = {4: 8, 2: 16, 1: 32}.get(act_bytes, 8)

    # Largest power-of-two row tile (<= 2048) fitting a ~40 MiB budget
    # (conservative for v7x's 64 MiB physical VMEM; plenty on v5e/v6e).
    budget = 40 * 1024 * 1024
    w_tile_bytes = 2 * tn * tk * w_bytes              # double-buffered weight tile
    tm = 2048
    while tm > min_tm:
        need = (2 * tm * tk * act_bytes               # x, double-buffered
                + 2 * tm * tn * act_bytes             # residual, double-buffered
                + 2 * tm * tn * act_bytes             # out, double-buffered
                + tm * tn * 4                         # f32 accumulator scratch
                + w_tile_bytes)
        if need <= budget:
            break
        tm //= 2

    # Keep >= 2 steps on the (parallel) M axis when possible so v7x's two
    # TensorCores are both occupied.
    while tm > min_tm and pl.cdiv(M, tm) < 2:
        tm //= 2

    return tm, tn, tk


def molt_output(hidden_states, input_tensor, weight):
    """MolTOutput forward.

    hidden_states: [B, S, I]  intermediate activations
    input_tensor:  [B, S, H]  residual
    weight:        [H, I]     nn.Linear(I, H, bias=False) weight (PyTorch layout)
    """
    B, S, I = hidden_states.shape
    H = input_tensor.shape[-1]
    assert weight.shape == (H, I)

    M = B * S
    x2d = hidden_states.reshape(M, I)
    r2d = input_tensor.reshape(M, H)

    act_bytes = x2d.dtype.itemsize
    w_bytes = weight.dtype.itemsize
    tm, tn, tk = _choose_tiles(M, I, H, act_bytes, w_bytes)

    # Pad rows up to a multiple of tm (padded rows compute 0 @ W + 0 and are
    # sliced off below) -- graceful handling of ragged M instead of one giant
    # unbounded block.
    M_pad = pl.cdiv(M, tm) * tm
    if M_pad != M:
        x2d = jnp.pad(x2d, ((0, M_pad - M), (0, 0)))
        r2d = jnp.pad(r2d, ((0, M_pad - M), (0, 0)))

    grid = (M_pad // tm, pl.cdiv(H, tn), pl.cdiv(I, tk))

    # Scoped VMEM sized to the chosen tiles (with headroom), capped for v7x.
    vmem_need = (2 * tm * tk * act_bytes
                 + 4 * tm * tn * act_bytes
                 + 2 * tn * tk * w_bytes
                 + tm * tn * 4)
    vmem_limit = int(min(64 * 1024 * 1024,
                         max(32 * 1024 * 1024, vmem_need + (4 << 20))))

    cost = pl.CostEstimate(
        flops=2 * M_pad * I * H,
        transcendentals=0,
        bytes_accessed=(M_pad * I * act_bytes        # activations read
                        + H * I * w_bytes            # weight read
                        + M_pad * H * act_bytes      # residual read
                        + M_pad * H * act_bytes),    # output write
    )

    out2d = pl.pallas_call(
        _molt_output_kernel,
        out_shape=jax.ShapeDtypeStruct((M_pad, H), hidden_states.dtype),
        grid_spec=pltpu.PrefetchScalarGridSpec(
            num_scalar_prefetch=0,
            grid=grid,
            in_specs=[
                pl.BlockSpec((tm, tk), lambda i, j, k: (i, k)),   # activations
                pl.BlockSpec((tn, tk), lambda i, j, k: (j, k)),   # weight [H, I]
                pl.BlockSpec((tm, tn), lambda i, j, k: (i, j)),   # residual
            ],
            out_specs=pl.BlockSpec((tm, tn), lambda i, j, k: (i, j)),
            scratch_shapes=[pltpu.VMEM((tm, tn), jnp.float32)],
        ),
        compiler_params=pltpu.CompilerParams(
            dimension_semantics=("parallel", "parallel", "arbitrary"),
            vmem_limit_bytes=vmem_limit,
        ),
        cost_estimate=cost,
    )(x2d, weight, r2d)

    if M_pad != M:
        out2d = out2d[:M]
    return out2d.reshape(B, S, H)


if __name__ == "__main__":
    # Small config consistent with the module: intermediate_size=64, hidden_size=32.
    B, S = 2, 8
    intermediate_size = 64
    hidden_size = 32

    key = jax.random.PRNGKey(0)
    k1, k2, k3 = jax.random.split(key, 3)

    hidden_states = jax.random.normal(k1, (B, S, intermediate_size), dtype=jnp.float32)
    input_tensor = jax.random.normal(k2, (B, S, hidden_size), dtype=jnp.float32)
    # nn.Linear(intermediate_size, hidden_size, bias=False): weight shape [H, I]
    weight = jax.random.normal(
        k3, (hidden_size, intermediate_size), dtype=jnp.float32) * 0.02

    out = molt_output(hidden_states, input_tensor, weight)
    out = jax.block_until_ready(out)

    # Reference check in plain JAX.
    ref = jnp.einsum("bsi,hi->bsh", hidden_states, weight) + input_tensor
    assert out.shape == (B, S, hidden_size)
    assert jnp.allclose(out, ref, atol=1e-4, rtol=1e-4)

    print("KERNEL_OK")
</pallas_src>

<mosaic_0001>
module attributes {stable_mosaic.version = 11 : i64} {
  func.func @_molt_output_kernel(%arg0: i32, %arg1: i32, %arg2: i32, %arg3: memref<8x64xf32, #tpu.memory_space<vmem>>, %arg4: memref<32x64xf32, #tpu.memory_space<vmem>>, %arg5: memref<8x32xf32, #tpu.memory_space<vmem>>, %arg6: memref<8x32xf32, #tpu.memory_space<vmem>>, %arg7: memref<8x32xf32, #tpu.memory_space<vmem>>) attributes {dimension_semantics = [#tpu.dimension_semantics<parallel>, #tpu.dimension_semantics<parallel>, #tpu.dimension_semantics<arbitrary>], iteration_bounds = array<i64: 2, 1, 1>, scalar_prefetch = 0 : i64, scratch_operands = 1 : i64, tpu.core_type = #tpu.core_type<tc>, window_params = [{transform_indices = @transform_0, window_bounds = array<i64: 8, 64>}, {transform_indices = @transform_1, window_bounds = array<i64: 32, 64>}, {transform_indices = @transform_2, window_bounds = array<i64: 8, 32>}, {transform_indices = @transform_3, window_bounds = array<i64: 8, 32>}]} {
    %c0_i32 = arith.constant 0 : i32
    %0 = arith.cmpi eq, %arg2, %c0_i32 : i32
    %1 = arith.extui %0 : i1 to i32
    %c0_i32_0 = arith.constant 0 : i32
    %2 = arith.cmpi ne, %1, %c0_i32_0 : i32
    scf.if %2 {
      %cst_10 = arith.constant 0.000000e+00 : f32
      %12 = vector.broadcast %cst_10 : f32 to vector<8x32xf32>
      %c0_11 = arith.constant 0 : index
      %c0_12 = arith.constant 0 : index
      %13 = vector.load %arg7[%c0_11, %c0_12] : memref<8x32xf32, #tpu.memory_space<vmem>>, vector<8x32xf32>
      tpu.vector_store %arg7[%c0_11, %c0_12], %12 {strides = array<i32>} : memref<8x32xf32, #tpu.memory_space<vmem>>, vector<8x32xf32>,
    } else {
    }
    %c0 = arith.constant 0 : index
    %c0_1 = arith.constant 0 : index
    %3 = vector.load %arg7[%c0, %c0_1] : memref<8x32xf32, #tpu.memory_space<vmem>>, vector<8x32xf32>
    %c0_2 = arith.constant 0 : index
    %c0_3 = arith.constant 0 : index
    %4 = vector.load %arg3[%c0_2, %c0_3] : memref<8x64xf32, #tpu.memory_space<vmem>>, vector<8x64xf32>
    %c0_4 = arith.constant 0 : index
    %c0_5 = arith.constant 0 : index
    %5 = vector.load %arg4[%c0_4, %c0_5] : memref<32x64xf32, #tpu.memory_space<vmem>>, vector<32x64xf32>
    %cst = arith.constant dense<0.000000e+00> : vector<8x32xf32>
    %6 = tpu.matmul %4, %5, %cst {dimension_numbers = #tpu.dot_dimension_numbers<[1], [1], [0], [0], [0, 0, 1, 0], [], []>} : vector<8x64xf32>, vector<32x64xf32>, vector<8x32xf32> -> vector<8x32xf32>
    %7 = arith.addf %3, %6 : vector<8x32xf32>
    %c0_6 = arith.constant 0 : index
    %c0_7 = arith.constant 0 : index
    %8 = vector.load %arg7[%c0_6, %c0_7] : memref<8x32xf32, #tpu.memory_space<vmem>>, vector<8x32xf32>
    tpu.vector_store %arg7[%c0_6, %c0_7], %7 {strides = array<i32>} : memref<8x32xf32, #tpu.memory_space<vmem>>, vector<8x32xf32>,
    %c0_i32_8 = arith.constant 0 : i32
    %9 = arith.cmpi eq, %arg2, %c0_i32_8 : i32
    %10 = arith.extui %9 : i1 to i32
    %c0_i32_9 = arith.constant 0 : i32
    %11 = arith.cmpi ne, %10, %c0_i32_9 : i32
    scf.if %11 {
      %c0_10 = arith.constant 0 : index
      %c0_11 = arith.constant 0 : index
      %12 = vector.load %arg7[%c0_10, %c0_11] : memref<8x32xf32, #tpu.memory_space<vmem>>, vector<8x32xf32>
      %c0_12 = arith.constant 0 : index
      %c0_13 = arith.constant 0 : index
      %13 = vector.load %arg5[%c0_12, %c0_13] : memref<8x32xf32, #tpu.memory_space<vmem>>, vector<8x32xf32>
      %14 = arith.addf %12, %13 : vector<8x32xf32>
      %c0_14 = arith.constant 0 : index
      %c0_15 = arith.constant 0 : index
      %15 = vector.load %arg6[%c0_14, %c0_15] : memref<8x32xf32, #tpu.memory_space<vmem>>, vector<8x32xf32>
      tpu.vector_store %arg6[%c0_14, %c0_15], %14 {strides = array<i32>} : memref<8x32xf32, #tpu.memory_space<vmem>>, vector<8x32xf32>,
    } else {
    }
    return
  }
  func.func @transform_0(%arg0: i32, %arg1: i32, %arg2: i32) -> (i32, i32) {
    %c0_i32 = arith.constant 0 : i32
    return %arg0, %arg2 : i32, i32
  }
  func.func @transform_1(%arg0: i32, %arg1: i32, %arg2: i32) -> (i32, i32) {
    %c0_i32 = arith.constant 0 : i32
    return %arg1, %arg2 : i32, i32
  }
  func.func @transform_2(%arg0: i32, %arg1: i32, %arg2: i32) -> (i32, i32) {
    %c0_i32 = arith.constant 0 : i32
    return %arg0, %arg1 : i32, i32
  }
  func.func @transform_3(%arg0: i32, %arg1: i32, %arg2: i32) -> (i32, i32) {
    %c0_i32 = arith.constant 0 : i32
    return %arg0, %arg1 : i32, i32
  }
}

</mosaic_0001>

<bundles_post_ra>
// kernel: tpu_custom_call.1
= control target key start
LH: loop header
LB: loop body
LE: loop exit
PB: predicated region body
PF: predicated region fallthrough
CT: control target
= control target key end

     0   :  { %8 = vsyncpa [#allocation4], 0  ;;  %s1040_s0 = inlined_call_operand.hbm [shape: f32[16,64], index: 0, kind: input, shape index: {}]   ;;  %s1041_s1 = inlined_call_operand.hbm [shape: f32[32,64], index: 1, kind: input, shape index: {}]   ;;  %s1042_s2 = inlined_call_operand.hbm [shape: f32[16,32], index: 2, kind: input, shape index: {}]   ;;  %s1043_s3 = inlined_call_operand.hbm [shape: f32[16,32], index: 3, kind: output, shape index: {}]  }
   0x1   :  { %10 = vsyncpa [#allocation4 + $0x1], 0 }
   0x2   :  { %11 = vsyncpa [#allocation7], 0 }
   0x3   :  { %12 = vsyncpa [#allocation5], 0 }
   0x4   :  { %14 = vsyncpa [#allocation5 + $0x1], 0  ;;  %s836_s12 = smov 0   ;;  %s838_s13 = smov 0  }
   0x5   :  { %s840_s14 = smov 0   ;;  %s842_s15 = smov 0  }
   0x6   :  { %s844_s16 = smov 0   ;;  %s846_s17 = smov 0  }
   0x7 LB: > { %s39_s18 = sadd.s32 1, %s802_s16  ;;  %s48_s19 = sadd.s32 1, %s794_s14  ;;  %s806_s17 = sphi %s846_s17, %s20_s17   ;;  %s802_s16 = sphi %s844_s16, %s1063_s16   ;;  %s798_s15 = sphi %s842_s15, %s1062_s15   ;;  %s794_s14 = sphi %s840_s14, %s1061_s14   ;;  %s790_s13 = sphi %s838_s13, %s1060_s13   ;;  %s786_s12 = sphi %s836_s12, %s1059_s12  }
   0x8   : > { %p41_p0 = scmp.ge.s32.totalorder %s39_s18, 2  ;;  %p55_p1 = scmp.ne.s32.totalorder %s794_s14, %s790_s13 }
   0x9   : > { %p56_p2 = scmp.eq.s32.totalorder %s806_s17, 0  ;;  %p580_p5 = scmp.lt.s32.totalorder %s806_s17, 2 }
   0xa   : > { %s1065_s18 = smov (%p41_p0, %s39_s18), 0  ;;  %s186_s21 = sand.u32 1, %s806_s17  }
   0xb   : > { %p57_p4 = por %p56_p2, %p55_p1  ;;  %s43_s20 = ssub.s32 %s802_s16, %s1065_s18 }
   0xc   : > { %p46_p6 = scmp.eq.s32.totalorder %s43_s20, 0  ;;  %s188_s22 = sand.u32 1, %s794_s14  }
   0xd   : > { %s521_s23 = sshll.u32 %s802_s16, 7  ;;  %s886_s25 = sshll.u32 %s188_s22, 3 }
   0xe   : > { %s884_s24 = scalar_select %p46_p6, %s794_s14, %s48_s19  }
   0xf   : > { %s196_s28 = scalar_lea.hbm %s1040_s0, %s521_s23  ;;  %p893_p7 = pnand %p580_p5, %p57_p4 }
  0x10   : > { %s190_s30 = scalar_lea.vmem [#allocation3], %s886_s25  ;;  %s898_s5 = scalar_lea.sflag [#allocation4], %s186_s21 }
  0x11   : > { %s198_s4 = sshll.u32 %s190_s30, 4  ;;  %p638_p8 = pneg %p893_p7  ;;  %s199_s4 = int_to_ptr.vmem [resolvable:$true] %s198_s4 }
  0x12   : > { %s649_s6 = scalar_lea.vmem %s199_s4, 128  ;;  %s808_s7 = smov [#allocation3]  }
  0x13   : > { %p650_p9 = scmp.ne.s32.totalorder %s199_s4, %s649_s6  ;;  %s654_s8 = sshll.u32 %s808_s7, 4  ;;  %s655_s8 = int_to_ptr.vmem [resolvable:$false] %s654_s8 }
  0x14   : > { %s656_s9 = scalar_lea.vmem %s655_s8, 256  ;;  %p657_p12 = scmp.lt.s32.totalorder %s199_s4, %s655_s8 }
  0x15   : > { %p652_p10 = pnand %p650_p9, %p638_p8  ;;  %p658_p13 = scmp.lt.s32.totalorder %s656_s9, %s649_s6 }
  0x17   : > { %p653_p11 = pneg %p652_p10  ;;  %p659_p0 = por %p658_p13, %p657_p12 }
  0x19   : > { %p660_p2 = pnand %p659_p0, %p653_p11 }
  0x1b   : > { %663 = shalt.err (!%p660_p2)
}
  0x1c   : > { %571 = dma.hbm_to_vmem [thread:$0]  (!%p893_p7), %s196_s28, 128, %s199_s4, %s898_s5  }
  0x1d   : > { %s909_s10 = sadd.s32 4294967295, %s806_s17   ;;  %s516_s11 = sadd.s32 4294967294, %s806_s17  }
  0x1e   : > { %p61_p4 = scmp.ne.s32.totalorder %s790_s13, %s786_s12  ;;  %p1045_p5 = scmp.eq.s32.totalorder %s909_s10, 0 }
  0x1f   : > { %p143_p6 = scmp.eq.s32.totalorder %s909_s10, 1  ;;  %p149_p9 = scmp.eq.s32.totalorder %s516_s11, 1 }
  0x20   : > { %p517_p10 = scmp.ge.s32.totalorder %s806_s17, 1  ;;  %p919_p11 = por %p1045_p5, %p61_p4 }
  0x21   : > { %p926_p12 = por %p143_p6, %p55_p1  ;;  %p930_p13 = por %p149_p9, %p61_p4 }
  0x22   : > { %s1048_s19 = scalar_select %p919_p11, 1, 0 }
  0x23   : > { %s1049_s20 = scalar_select %p926_p12, 1, 0 }
  0x24   : > { %s1050_s21 = scalar_select %p930_p13, 1, 0 }
  0x25   : > { %p156_p0 = scmp.lt.s32.totalorder %s806_s17, 3  ;;  %s809_s26 = smov [#allocation6]  }
  0x26   : > { %s172_s27 = sshll.u32 %s809_s26, 4  ;;  %s215_s4 = scalar_lea.hbm %s1042_s2, %s521_s23  ;;  %s944_s27 = int_to_ptr.vmem [resolvable:$true] %s172_s27 }
  0x27   : > { %p935_p2 = pnand %p517_p10, %p156_p0  ;;  %s209_s6 = scalar_lea.vmem [#allocation8], %s886_s25 }
  0x28   : > { %s217_s7 = sshll.u32 %s209_s6, 4  ;;  %s810_s11 = smov [#allocation8]   ;;  %s218_s7 = int_to_ptr.vmem [resolvable:$true] %s217_s7 }
  0x29   : > { %p564_p1 = pneg %p935_p2  ;;  %s677_s9 = scalar_lea.vmem %s218_s7, 128 }
  0x2a   : > { %p678_p6 = scmp.ne.s32.totalorder %s218_s7, %s677_s9  ;;  %s682_s23 = sshll.u32 %s810_s11, 4  ;;  %s683_s23 = int_to_ptr.vmem [resolvable:$false] %s682_s23 }
  0x2b   : > { %p951_p4 = pnand %p564_p1, %p1045_p5  ;;  %s684_s26 = scalar_lea.vmem %s683_s23, 256 }
  0x2c   : > { %p680_p9 = pnand %p678_p6, %p638_p8  ;;  %p685_p0 = scmp.lt.s32.totalorder %s218_s7, %s683_s23 }
  0x2d   : > { %p686_p3 = scmp.lt.s32.totalorder %s684_s26, %s677_s9 }
  0x2e   : > { %p681_p10 = pneg %p680_p9 }
  0x2f   : > { %p687_p13 = por %p686_p3, %p685_p0 }
  0x31   : > { %p688_p12 = pnand %p687_p13, %p681_p10 }
  0x33   : > { %691 = shalt.err (!%p688_p12)
}
  0x34   : > { %574 = dma.hbm_to_vmem [thread:$0]  (!%p893_p7), %s215_s4, 128, %s218_s7, %s898_s5  }
  0x35   : > { %p694_p8 = pneg %p951_p4  ;;  %s703_s25 = scalar_lea.vmem %s944_s27, 512 }
  0x36   : > { %p704_p1 = scmp.ne.s32.totalorder %s944_s27, %s703_s25  ;;  %p711_p5 = scmp.lt.s32.totalorder %s944_s27, %s944_s27 }
  0x37   : > { %p712_p11 = scmp.lt.s32.totalorder %s703_s25, %s703_s25 }
  0x38   : > { %p706_p6 = pnand %p704_p1, %p694_p8 }
  0x39   : > { %p713_p3 = por %p712_p11, %p711_p5 }
  0x3a   : > { %p707_p9 = pneg %p706_p6 }
  0x3c   : > { %p714_p13 = pnand %p713_p3, %p707_p9 }
  0x3e   : > { %717 = shalt.err (!%p714_p13)
}
  0x3f   : > { %s811_s28 = smov 128   ;;  %s812_s29 = smov 8  }
  0x40   : > { %567 = dma.hbm_to_vmem [thread:$0]  (!%p951_p4), %s1041_s1, 512, %s944_s27, [#allocation7], %s811_s28, %s811_s28, %s812_s29  }
  0x41   : > { %226 = sbr.rel (%p935_p2) target bundleno = 312 (0x138), region = 32  ;;  %s228_s5 = sand.u32 (!%p935_p2), 1, %s909_s10  }
  0x42   : > { %s230_s4 = sand.u32 (!%p935_p2), 1, %s790_s13   ;;  %s229_s9 = scalar_lea.sflag (!%p935_p2), [#allocation4], %s228_s5 }
  0x43   : > { %s979_s7 = sshll.u32 (!%p935_p2), %s230_s4, 3  ;;  %p1053_p7 = scmp.ne.s32.totalorder (!%p935_p2), %s1048_s19, 0 }
  0x44   : > { %s232_s11 = scalar_lea.vmem (!%p935_p2), [#allocation3], %s979_s7 }
  0x46   : > { %769 = dma.done.wait (%p1053_p7), %s229_s9, 128  }
  0x47   : > { %771 = vsyncadd (%p1053_p7), %s229_s9, 4294967168  ;;  %p1054_p5 = scmp.eq.s32.totalorder %s909_s10, 0 }
  0x49   : > { %773 = dma.done.wait (%p1054_p5), [#allocation7], 512   ;;  %p1055_p11 = pmov %p1054_p5 }
  0x4a   : > { %s245_s22 = scalar_lea.vmem [#allocation8], %s979_s7 }
  0x4b   : > { %775 = vsyncadd (%p1055_p11), [#allocation7], 4294966784 }
  0x4c   : > { %777 = dma.done.wait (%p1053_p7), %s229_s9, 128  }
  0x4d   : > { %779 = vsyncadd (%p1053_p7), %s229_s9, 4294967168  ;;  %vm278_vm0 = vcmask 261120   ;;  %v813_v0 = vmov 0.0   ;;  %vm814_vm1 = vmmov 0   ;;  %vm286_vm2 = vcmask 523264   ;;  %v285_v1 = vld [vmem:[#allocation6 + $0x18] sm:$0xff] }
  0x4e   : > { %543 = vmatprep.subr.mxu0 %v813_v0  ;;  %551 = vmatprep.mubr.msk.f32.mxu0 %vm814_vm1, %v813_v0  ;;  %279 = vst.msk [vmem:[#allocation2] sm:$0xff] %vm278_vm0, %v813_v0  ;;  %v284_v2 = vld [vmem:[#allocation6 + $0x10] sm:$0xff]  ;;  %v283_v3 = vld [vmem:[#allocation6 + $0x8] sm:$0xff]  ;;  %v282_v4 = vld [vmem:[#allocation6] sm:$0xff]  ;;  %s535_s10 = sshll.u32 %s798_s15, 7  ;;  %s272_s19 = scalar_lea.vmem [#allocation9], %s979_s7 }
  0x4f   : > { %544 = vmatpush3.xpose.msk.msra.mxu0 %vm286_vm2, %v285_v1  ;;  %v281_v5 = vld [vmem:[%s232_s11] sm:$0xff]  ;;  %v379_v10 = vld [vmem:[%s245_s22] sm:$0xff]  ;;  %s397_s27 = sshll.u32 %s272_s19, 4  ;;  %s395_s26 = scalar_lea.hbm %s1043_s3, %s535_s10  ;;  %s398_s27 = int_to_ptr.vmem [resolvable:$true] %s397_s27 }
  0x50   : > { %545 = vmatprep.subr.mxu0 %v813_v0  ;;  %s383_s25 = scalar_lea.sflag [#allocation5], %s230_s4  ;;  %s718_s28 = scalar_lea.vmem %s398_s27, 128 }
  0x51   : > { %p719_p12 = scmp.ne.s32.totalorder %s398_s27, %s718_s28  ;;  %p1056_p2 = scmp.ne.s32.totalorder %s1049_s20, 0 }
  0x52   : > { %s815_s29 = smov [#allocation9]  }
  0x53   : > { %546 = vmatpush3.xpose.msk.msra.mxu0 %vm286_vm2, %v284_v2  ;;  %p720_p4 = pnand %p719_p12, %p1056_p2  ;;  %s722_s15 = sshll.u32 %s815_s29, 4  ;;  %s723_s15 = int_to_ptr.vmem [resolvable:$false] %s722_s15 }
  0x54   : > { %547 = vmatprep.subr.mxu0 %v813_v0  ;;  %s724_s30 = scalar_lea.vmem %s723_s15, 256  ;;  %p725_p0 = scmp.lt.s32.totalorder %s398_s27, %s723_s15 }
  0x55   : > { %v280_v6 = vld [vmem:[#allocation2] sm:$0xff]  ;;  %p721_p10 = pneg %p720_p4  ;;  %p726_p8 = scmp.lt.s32.totalorder %s724_s30, %s718_s28 }
  0x57   : > { %548 = vmatpush3.xpose.msk.msra.mxu0 %vm286_vm2, %v283_v3  ;;  %p727_p1 = por %p726_p8, %p725_p0 }
  0x58   : > { %549 = vmatprep.subr.mxu0 %v813_v0 }
  0x59   : > { %p728_p6 = pnand %p727_p1, %p721_p10 }
  0x5b   : > { %550 = vmatpush3.xpose.msk.msra.mxu0 %vm286_vm2, %v282_v4 }
  0x5e   : > { %552 = vmatmul.mubr.msk.f32.vlgmr.msra.gmra.mxu0 %vm286_vm2, %v281_v5 }
 0x11e   : > { %v368_v7 = vpop.f32.mrf.mxu0 }
 0x11f   : > { %v372_v8 = vadd.f32 %v368_v7, %v280_v6 }
 0x120   : > { %v553_v9 = vpop.f32.mrf.mxu0 }
 0x121   : > { %374 = vst.msk [vmem:[#allocation2] sm:$0xff] %vm278_vm0, %v372_v8 }
 0x128   : > { %v378_v11 = vld [vmem:[#allocation2] sm:$0xff] }
 0x129   : > { %v380_v12 = vadd.f32 %v379_v10, %v378_v11 }
 0x12b   : > { %381 = vst.msk [vmem:[%s272_s19] sm:$0xff] %vm278_vm0, %v380_v12 }
 0x12c   : > { %731 = shalt.err (!%p728_p6)
}
 0x12d   : > { %s732_s6 = scalar_lea.hbm %s395_s26, 128  ;;  %s736_s7 = scalar_lea.hbm %s1043_s3, 256 }
 0x12e   : > { %p733_p9 = scmp.ne.s32.totalorder %s395_s26, %s732_s6  ;;  %p737_p7 = scmp.lt.s32.totalorder %s395_s26, %s1043_s3 }
 0x12f   : > { %p738_p5 = scmp.lt.s32.totalorder %s736_s7, %s732_s6 }
 0x130   : > { %p734_p3 = pnand %p733_p9, %p1056_p2 }
 0x131   : > { %p739_p11 = por %p738_p5, %p737_p7 }
 0x132   : > { %p735_p13 = pneg %p734_p3 }
 0x134   : > { %p740_p12 = pnand %p739_p11, %p735_p13 }
 0x136   : > { %743 = shalt.err (!%p740_p12)
}
 0x137   : > { %562 = dma.vmem_to_hbm [thread:$0]  (%p1056_p2), %s398_s27, 128, %s395_s26, %s383_s25  }
 0x138 PF: > { %s409_s22 = sand.u32 1, %s786_s12   ;;  %p1057_p4 = scmp.ne.s32.totalorder %s1050_s21, 0 }
 0x139   : > { %p1058_p10 = scmp.ge.s32.totalorder %s806_s17, 2  ;;  %s410_s10 = scalar_lea.sflag [#allocation5], %s409_s22 }
 0x13b   : > { %p576_p0 = pnand %p1058_p10, %p1057_p4 }
 0x13d   : > { %p577_p8 = pneg %p576_p0 }
 0x13f   : > { %781 = dma.done.wait (%p577_p8), %s410_s10, 128  }
 0x140   : > { %783 = vsyncadd (%p577_p8), %s410_s10, 4294967168  ;;  %s20_s17 = sadd.s32 1, %s806_s17   ;;  %s1059_s12 = smov %s790_s13 }
 0x141   : > { %p17_p1 = scmp.ge.s32.totalorder %s20_s17, 4   ;;  %s1060_s13 = smov %s794_s14 }
 0x142   : > { %s1061_s14 = smov %s884_s24  ;;  %s1062_s15 = smov %s802_s16 }
 0x143   : > { %s1063_s16 = smov %s1065_s18  ;;  %19 = sbr.rel (!%p17_p1) target bundleno = 7 (0x7), region = 101 }
 0x148   :  { %415 = vsyncpa [#allocation4], 1 }
 0x149   :  { %417 = vsyncpa [#allocation4 + $0x1], 1 }
 0x14a   :  { %418 = vsyncpa [#allocation7], 1 }
 0x14b   :  { %419 = vsyncpa [#allocation5], 1 }
 0x14c   :  { %421 = vsyncpa [#allocation5 + $0x1], 1 }

</bundles_post_ra>
